<compile_context>
chip_gen: v5e
topology: v5e:2x2
jax: 0.10.0
libtpu: 0.0.40
codegen_flags: <defaults>
</compile_context>

<pallas_src>
import jax
import jax.numpy as jnp
from jax.experimental import pallas as pl
from jax.experimental.pallas import tpu as pltpu


def _pooler_kernel(x_ref, w_ref, b_ref, o_ref):
    # x_ref: [B, H_in]    CLS-token activations, resident across all grid steps
    # w_ref: [H_in, TN]   weight tile, (in, out) layout (pre-transposed once)
    # b_ref: [1,  TN]     bias tile (broadcast over batch)
    # o_ref: [B,  TN]
    y = jnp.dot(x_ref[...], w_ref[...], preferred_element_type=jnp.float32)
    y = y + b_ref[...].astype(jnp.float32)
    o_ref[...] = jnp.tanh(y).astype(o_ref.dtype)


def _pick_tn(h_out, h_in, itemsize):
    """Output-feature tile size.

    Largest divisor of h_out that is a lane-aligned multiple of 128, capped so
    (a) the double-buffered (h_in, tn) weight tile fits a conservative VMEM
        budget (safe on v7x's 64 MiB parts), and
    (b) tn <= h_out // 2 when possible, so there are >= 2 tiles along the
        feature axis for megacore sharding on v7x.
    Falls back to the full extent when h_out is not 128-divisible (always a
    legal block shape)."""
    if h_out % 128 != 0:
        return h_out
    weight_budget = 24 * 1024 * 1024          # double-buffered weight tile cap
    pref = min(512, h_out // 2) if h_out >= 256 else h_out
    pref = max(pref, 128)
    best = 128
    t = 128
    while t <= pref:
        if h_out % t == 0 and 2 * t * h_in * itemsize <= weight_budget:
            best = t
        t += 128
    return best


def vit_pooler(hidden_states, weight, bias):
    """ViTPooler forward: tanh(hidden_states[:, 0] @ weight.T + bias).

    hidden_states: [B, S, H]
    weight:        [H_out, H_in]  (PyTorch nn.Linear layout, H_out == H_in == H)
    bias:          [H_out]
    """
    B, S, H = hidden_states.shape
    H_out, H_in = weight.shape
    assert H_in == H and H_out == H, "ViTPooler uses a square Linear(H, H)"

    # CLS slice in the wrapper: contiguous [B, H], only B*H bytes, fuses with
    # the producer.  Cheaper and safer than a size-1 squeezed BlockSpec dim.
    x = hidden_states[:, 0, :]

    # One-time layout change of a static parameter -> (in, out); the kernel
    # then does a plain A @ B on the MXU with no per-step transpose.
    # TODO(synk): in a real model, precompute w_t once outside the jitted fwd.
    w_t = weight.T
    b2d = bias.reshape(1, H_out)

    itemsize = jnp.dtype(weight.dtype).itemsize
    x_bytes = jnp.dtype(hidden_states.dtype).itemsize

    tn = _pick_tn(H_out, H_in, itemsize)
    grid = (H_out // tn,)

    # Explicit VMEM budget: resident x block + double-buffered weight/bias/out
    # tiles, with 2x headroom, capped at 32 MiB (fits every generation).
    footprint = (B * H_in * x_bytes
                 + 2 * H_in * tn * itemsize
                 + 2 * tn * itemsize
                 + 2 * B * tn * x_bytes)
    vmem_limit = int(min(32 * 1024 * 1024, max(2 * footprint, 4 * 1024 * 1024)))

    cost = pl.CostEstimate(
        flops=2 * B * H_in * H_out,
        transcendentals=B * H_out,
        bytes_accessed=(B * H_in * x_bytes        # CLS-token read
                        + H_in * H_out * itemsize  # weight read (exactly once)
                        + H_out * itemsize         # bias read
                        + B * H_out * x_bytes),    # output write
    )

    return pl.pallas_call(
        _pooler_kernel,
        out_shape=jax.ShapeDtypeStruct((B, H_out), hidden_states.dtype),
        grid=grid,
        in_specs=[
            # Resident CLS slab: constant index_map -> fetched once, kept in
            # VMEM across all feature tiles (weight is the only streamed term).
            pl.BlockSpec((B, H_in), lambda n: (0, 0)),
            # Weight tiled over output features only; K = H_in un-tiled.
            pl.BlockSpec((H_in, tn), lambda n: (0, n)),
            # Bias tile matching the output-feature tile.
            pl.BlockSpec((1, tn), lambda n: (0, n)),
        ],
        out_specs=pl.BlockSpec((B, tn), lambda n: (0, n)),
        compiler_params=pltpu.CompilerParams(
            # Feature-axis tiles are independent: shard across v7x TensorCores
            # (halves per-core weight bytes); no-op on single-TC v5e/v6e.
            dimension_semantics=("parallel",),
            vmem_limit_bytes=vmem_limit,
        ),
        cost_estimate=cost,
    )(x, w_t, b2d)


if __name__ == "__main__":
    # Small shapes consistent with the module: batch=2, seq=8, hidden=32.
    B, S, H = 2, 8, 32
    key = jax.random.PRNGKey(0)
    k_x, k_w, k_b = jax.random.split(key, 3)

    hidden_states = jax.random.normal(k_x, (B, S, H), dtype=jnp.float32)
    # Deterministic synthetic parameters (nn.Linear(hidden, hidden) shapes).
    weight = jax.random.normal(k_w, (H, H), dtype=jnp.float32) * (1.0 / H ** 0.5)
    bias = jax.random.normal(k_b, (H,), dtype=jnp.float32) * 0.02

    pooled = jax.jit(vit_pooler)(hidden_states, weight, bias)
    jax.block_until_ready(pooled)

    # Reference check in plain JAX (same math as the PyTorch module).
    ref = jnp.tanh(hidden_states[:, 0, :] @ weight.T + bias)
    assert pooled.shape == (B, H)
    assert jnp.allclose(pooled, ref, atol=1e-5, rtol=1e-5)

    print("KERNEL_OK")
</pallas_src>

<mosaic_0001>
module attributes {stable_mosaic.version = 11 : i64} {
  func.func @_pooler_kernel(%arg0: i32, %arg1: memref<2x32xf32, #tpu.memory_space<vmem>>, %arg2: memref<32x32xf32, #tpu.memory_space<vmem>>, %arg3: memref<1x32xf32, #tpu.memory_space<vmem>>, %arg4: memref<2x32xf32, #tpu.memory_space<vmem>>) attributes {dimension_semantics = [#tpu.dimension_semantics<parallel>], iteration_bounds = array<i64: 1>, scalar_prefetch = 0 : i64, scratch_operands = 0 : i64, tpu.core_type = #tpu.core_type<tc>, window_params = [{pipeline_mode = #tpu.pipeline_mode<synchronous>, transform_indices = @transform_0, window_bounds = array<i64: 2, 32>}, {transform_indices = @transform_1, window_bounds = array<i64: 32, 32>}, {transform_indices = @transform_2, window_bounds = array<i64: 1, 32>}, {transform_indices = @transform_3, window_bounds = array<i64: 2, 32>}]} {
    %c0 = arith.constant 0 : index
    %c0_0 = arith.constant 0 : index
    %0 = vector.load %arg1[%c0, %c0_0] : memref<2x32xf32, #tpu.memory_space<vmem>>, vector<2x32xf32>
    %c0_1 = arith.constant 0 : index
    %c0_2 = arith.constant 0 : index
    %1 = vector.load %arg2[%c0_1, %c0_2] : memref<32x32xf32, #tpu.memory_space<vmem>>, vector<32x32xf32>
    %cst = arith.constant dense<0.000000e+00> : vector<2x32xf32>
    %2 = tpu.matmul %0, %1, %cst {dimension_numbers = #tpu.dot_dimension_numbers<[1], [0], [0], [1], [0, 0, 1, 1], [], []>} : vector<2x32xf32>, vector<32x32xf32>, vector<2x32xf32> -> vector<2x32xf32>
    %c0_3 = arith.constant 0 : index
    %c0_4 = arith.constant 0 : index
    %3 = vector.load %arg3[%c0_3, %c0_4] : memref<1x32xf32, #tpu.memory_space<vmem>>, vector<1x32xf32>
    %4 = vector.broadcast %3 : vector<1x32xf32> to vector<2x32xf32>
    %5 = arith.addf %2, %4 : vector<2x32xf32>
    %6 = math.tanh %5 : vector<2x32xf32>
    %c0_5 = arith.constant 0 : index
    %c0_6 = arith.constant 0 : index
    %7 = vector.load %arg4[%c0_5, %c0_6] : memref<2x32xf32, #tpu.memory_space<vmem>>, vector<2x32xf32>
    tpu.vector_store %arg4[%c0_5, %c0_6], %6 {strides = array<i32>} : memref<2x32xf32, #tpu.memory_space<vmem>>, vector<2x32xf32>,
    return
  }
  func.func @transform_0(%arg0: i32) -> (i32, i32) {
    %c0_i32 = arith.constant 0 : i32
    %c0_i32_0 = arith.constant 0 : i32
    %c0_i32_1 = arith.constant 0 : i32
    return %c0_i32, %c0_i32_0 : i32, i32
  }
  func.func @transform_1(%arg0: i32) -> (i32, i32) {
    %c0_i32 = arith.constant 0 : i32
    %c0_i32_0 = arith.constant 0 : i32
    return %c0_i32, %arg0 : i32, i32
  }
  func.func @transform_2(%arg0: i32) -> (i32, i32) {
    %c0_i32 = arith.constant 0 : i32
    %c0_i32_0 = arith.constant 0 : i32
    return %c0_i32, %arg0 : i32, i32
  }
  func.func @transform_3(%arg0: i32) -> (i32, i32) {
    %c0_i32 = arith.constant 0 : i32
    %c0_i32_0 = arith.constant 0 : i32
    return %c0_i32, %arg0 : i32, i32
  }
}

</mosaic_0001>

<bundles_post_ra>
// kernel: vit_pooler.1
= control target key start
LH: loop header
LB: loop body
LE: loop exit
PB: predicated region body
PF: predicated region fallthrough
CT: control target
= control target key end

     0   :  { %s140_s0 = inlined_call_operand.vmem [shape: f32[2,32], index: 0, kind: input, shape index: {}]   ;;  %s141_s1 = inlined_call_operand.vmem [shape: f32[32,32], index: 1, kind: input, shape index: {}]   ;;  %s142_s2 = inlined_call_operand.vmem [shape: f32[1,32], index: 2, kind: input, shape index: {}]   ;;  %s143_s3 = inlined_call_operand.hbm [shape: f32[2,32], index: 3, kind: output, shape index: {}]  }
   0x1   :  { %v19_v0 = vld [vmem:[%s141_s1 + $0x18] sm:$0xff]  ;;  %v18_v1 = vld [vmem:[%s141_s1 + $0x10] sm:$0xff]  ;;  %v17_v2 = vld [vmem:[%s141_s1 + $0x8] sm:$0xff] }
   0x2   :  { %40 = vmatpush.msra.mxu0 %v19_v0 }
   0x3   :  { %8 = vsyncpa [#allocation3], 0  ;;  %v16_v3 = vld [vmem:[%s141_s1] sm:$0xff]  ;;  %vm24_vm0 = vcmask 261120   ;;  %s98_s24 = smov [#allocation2]   ;;  %s58_s1 = sshll.u32 %s143_s3, 4  ;;  %s59_s1 = int_to_ptr.hbm [resolvable:$true] %s58_s1 }
   0x4   :  { %41 = vmatpush.msra.mxu0 %v18_v1  ;;  %v15_v4 = vld [vmem:[%s140_s0] sm:$0x3]  ;;  %s56_s25 = sshll.u32 %s98_s24, 4  ;;  %vm49_vm1 = vcmask 254976   ;;  %s57_s25 = int_to_ptr.vmem [resolvable:$true] %s56_s25 }
   0x5   :  { %v69_v5 = vld [vmem:[%s142_s2] ss:$0 sm:$0xff] }
   0x6   :  { %42 = vmatpush.msra.mxu0 %v17_v2 }
   0x8   :  { %43 = vmatpush.msra.mxu0 %v16_v3 }
   0x9   :  { %67 = vmatmul.msk.f32.vlgmr.msra.gmra.mxu0 %vm24_vm0, %v15_v4 }
  0x86   :  { %v45_v6 = vpop.f32.mrf.mxu0 }
  0x87   :  { %v46_v7 = vadd.f32 %v69_v5, %v45_v6 }
  0x89   :  { %70 = vtanh.f32 %v46_v7 }
  0x8f   :  { %v71_v8 = vpop.eup %70 }
  0x90   :  { %50 = vst.msk [vmem:[#allocation2] sm:$0x3] %vm49_vm1, %v71_v8 }
  0x91   :  { %61 = dma.vmem_to_hbm [thread:$0]  %s57_s25, 32, %s59_s1, [#allocation3]  }
  0x92   :  { %96 = dma.done.wait [#allocation3], 32  }
  0x93   :  { %97 = vsyncadd [#allocation3], 4294967264 }
  0x94   :  { %66 = vsyncpa [#allocation3], 1 }

</bundles_post_ra>
